<compile_context>
chip_gen: v7x
topology: tpu7x:2x2x1
jax: 0.10.0
libtpu: 0.0.40
codegen_flags: <defaults>
</compile_context>

<pallas_src>
import functools

import jax
import jax.numpy as jnp
from jax.experimental import pallas as pl
from jax.experimental.pallas import tpu as pltpu

EPS = 1e-3  # BatchNorm2d(eps=0.001)


# --------------------------------------------------------------------------
# Kernels
# --------------------------------------------------------------------------
def _fused_kernel(x_ref, gamma_ref, beta_ref, alpha_ref, o_ref, *, inv_count):
    """Whole (N, c_tile, HW) channel slab resident: stats + BN + PReLU fused."""
    x = x_ref[...].astype(jnp.float32)                        # (N, Ct, HW)
    # Per-channel sum / sumsq: lane reduce first, then across N.
    s = jnp.sum(jnp.sum(x, axis=2, keepdims=True), axis=0, keepdims=True)
    q = jnp.sum(jnp.sum(x * x, axis=2, keepdims=True), axis=0, keepdims=True)
    mean = s * inv_count                                      # (1, Ct, 1)
    # Single-pass variance; clamp against catastrophic cancellation.
    var = jnp.maximum(q * inv_count - mean * mean, 0.0)
    inv_std = jax.lax.rsqrt(var + EPS)
    gamma = gamma_ref[...][None, :, :]                        # (1, Ct, 1)
    beta = beta_ref[...][None, :, :]
    alpha = alpha_ref[...][None, :, :]
    scale = gamma * inv_std
    shift = beta - mean * scale
    y = x * scale + shift
    o_ref[...] = jnp.where(y > 0, y, alpha * y).astype(o_ref.dtype)


def _stats_kernel(x_ref, sum_ref, sq_ref, sum_acc, sq_acc, *, hw_valid):
    """Fallback pass 1: accumulate per-channel sum / sumsq over (N, HW) tiles.

    Lane-chunked accumulation into (c_tile, 128) scratch (pure VALU adds); the
    cross-lane 128->1 reduction happens once, in the finalize. The tail hw
    block (when hw_tile does not divide hw) is masked with a lane-index
    compare, so no host-side padding of x is needed.
    """
    ni = pl.program_id(1)
    si = pl.program_id(2)

    @pl.when(jnp.logical_and(ni == 0, si == 0))
    def _init():
        sum_acc[...] = jnp.zeros_like(sum_acc)
        sq_acc[...] = jnp.zeros_like(sq_acc)

    c_tile, hw_tile = x_ref.shape
    n_chunks = hw_tile // 128
    lane = jax.lax.broadcasted_iota(jnp.int32, (c_tile, 128), 1)
    base = si * hw_tile

    def body(j, carry):
        s, q = carry
        off = pl.multiple_of(j * 128, 128)
        chunk = x_ref[:, pl.ds(off, 128)].astype(jnp.float32)
        col = base + off + lane
        chunk = jnp.where(col < hw_valid, chunk, 0.0)  # mask stale tail lanes
        return s + chunk, q + chunk * chunk

    s, q = jax.lax.fori_loop(0, n_chunks, body,
                             (sum_acc[...], sq_acc[...]), unroll=4)
    sum_acc[...] = s
    sq_acc[...] = q

    @pl.when(jnp.logical_and(ni == pl.num_programs(1) - 1,
                             si == pl.num_programs(2) - 1))
    def _finalize():
        sum_ref[...] = jnp.sum(sum_acc[...], axis=1, keepdims=True)  # (Ct, 1)
        sq_ref[...] = jnp.sum(sq_acc[...], axis=1, keepdims=True)


def _apply_kernel(x_ref, scale_ref, shift_ref, alpha_ref, o_ref):
    """Fallback pass 2: y = x*scale + shift, per-channel PReLU, lane-dense store."""
    x = x_ref[...].astype(jnp.float32)        # (Ct, HW_tile)
    y = x * scale_ref[...] + shift_ref[...]   # (Ct, 1) params broadcast
    o_ref[...] = jnp.where(y > 0, y, alpha_ref[...] * y).astype(o_ref.dtype)


# --------------------------------------------------------------------------
# Tiling helpers
# --------------------------------------------------------------------------
def _vmem_capacity():
    try:
        cap = getattr(pltpu.get_tpu_info(), "vmem_capacity_bytes", None)
        if cap:
            return int(cap)
    except Exception:
        pass
    return 64 << 20  # conservative default (v7x per-TC)


def _min_sublane(dtype):
    # Sub-32-bit dtypes pack along sublanes: (8,128) f32 / (16,128) bf16 / (32,128) i8.
    return {4: 8, 2: 16, 1: 32}.get(jnp.dtype(dtype).itemsize, 8)


def _pick_c_tile(c, dtype, max_tile=None):
    m = _min_sublane(dtype)
    if c % m != 0:
        return c  # full-extent channel block (required when C isn't tileable)
    cands = [d for d in range(m, c + 1, m) if c % d == 0]
    if max_tile is not None:
        fit = [d for d in cands if d <= max_tile]
        if fit:
            cands = fit
    # Prefer >=2 channel blocks so v7x can shard the (only) parallel axis
    # across both TensorCores; otherwise take the largest divisor.
    multi = [d for d in cands if c // d >= 2]
    return max(multi) if multi else max(cands)


def _pick_hw_tile(hw, c_tile, itemsize, usable_vmem):
    # Multi-MiB tiles to amortize the ~0.35us per-grid-step overhead, capped
    # generation-aware: <= usable_vmem/8 (covers 2 in + 2 out bufs + f32 temps)
    # and <= 8 MiB. No divisibility requirement on hw (tail handled in-kernel).
    tile_bytes_max = max(128 * c_tile * itemsize, min(usable_vmem // 8, 8 << 20))
    max_lanes = max(128, (tile_bytes_max // (c_tile * itemsize)) // 128 * 128)
    hw_rounded = ((hw + 127) // 128) * 128
    return int(min(hw_rounded, max_lanes))


# --------------------------------------------------------------------------
# Wrapper
# --------------------------------------------------------------------------
def bn_prelu(x, gamma, beta, alpha):
    """x: (N, C, H, W); gamma/beta/alpha: (C,). Returns (N, C, H, W)."""
    n, c, h, w = x.shape
    hw = h * w
    x3 = x.reshape(n, c, hw)  # contiguous -> free reshape, no transpose, no pad

    itemsize = jnp.dtype(x.dtype).itemsize
    usable = int(_vmem_capacity() * 0.7)  # generation-aware VMEM budget

    g2 = gamma.reshape(c, 1).astype(jnp.float32)
    b2 = beta.reshape(c, 1).astype(jnp.float32)
    a2 = alpha.reshape(c, 1).astype(jnp.float32)
    inv_count = 1.0 / float(n * hw)

    msub = _min_sublane(x.dtype)

    # ---- Path 1: fused single-read (one pass over x) ----------------------
    # Per-channel VMEM need: 2 in bufs + 2 out bufs + ~2 f32 intermediates.
    per_channel = n * hw * (4 * itemsize + 8)
    c_tile_max = usable // max(per_channel, 1)
    min_c_needed = msub if (c % msub == 0) else c
    if c_tile_max >= min_c_needed:
        c_tile = _pick_c_tile(c, x.dtype, max_tile=c_tile_max)
        c_blocks = c // c_tile
        x_spec = pl.BlockSpec((n, c_tile, hw), lambda ci: (0, ci, 0))
        p_spec = pl.BlockSpec((c_tile, 1), lambda ci: (ci, 0))
        out3 = pl.pallas_call(
            functools.partial(_fused_kernel, inv_count=inv_count),
            out_shape=jax.ShapeDtypeStruct((n, c, hw), x.dtype),
            grid_spec=pltpu.PrefetchScalarGridSpec(
                num_scalar_prefetch=0,
                grid=(c_blocks,),
                in_specs=[x_spec, p_spec, p_spec, p_spec],
                out_specs=x_spec),
            compiler_params=pltpu.CompilerParams(
                dimension_semantics=("parallel",),
                vmem_limit_bytes=usable),
        )(x3, g2, b2, a2)
        return out3.reshape(n, c, h, w)

    # ---- Path 2: two-pass streaming fallback (huge channel slabs) ----------
    c_tile = _pick_c_tile(c, x.dtype)
    c_blocks = c // c_tile
    hw_tile = _pick_hw_tile(hw, c_tile, itemsize, usable)
    hw_blocks = pl.cdiv(hw, hw_tile)

    x_spec = pl.BlockSpec((None, c_tile, hw_tile),
                          lambda ci, ni, si: (ni, ci, si))
    p_spec = pl.BlockSpec((c_tile, 1), lambda ci, ni, si: (ci, 0))

    # Pass 1: raw per-channel (sum, sumsq) only; gamma/beta stay out of the
    # kernel (no per-step re-DMA of tiny blocks).
    ssum, ssq = pl.pallas_call(
        functools.partial(_stats_kernel, hw_valid=hw),
        out_shape=(jax.ShapeDtypeStruct((c, 1), jnp.float32),
                   jax.ShapeDtypeStruct((c, 1), jnp.float32)),
        grid_spec=pltpu.PrefetchScalarGridSpec(
            num_scalar_prefetch=0,
            grid=(c_blocks, n, hw_blocks),
            in_specs=[x_spec],
            out_specs=[p_spec, p_spec],
            scratch_shapes=[pltpu.VMEM((c_tile, 128), jnp.float32),
                            pltpu.VMEM((c_tile, 128), jnp.float32)]),
        compiler_params=pltpu.CompilerParams(
            dimension_semantics=("parallel", "arbitrary", "arbitrary"),
            vmem_limit_bytes=usable),
    )(x3)

    # O(C) finalize in plain JAX between the two passes.
    mean = ssum * inv_count
    var = jnp.maximum(ssq * inv_count - mean * mean, 0.0)
    inv_std = jax.lax.rsqrt(var + EPS)
    scale = g2 * inv_std
    shift = b2 - mean * scale

    # Pass 2: normalize + PReLU, streamed tile-by-tile (partial tail hw block
    # is handled by Pallas: only the valid window is written back).
    out3 = pl.pallas_call(
        _apply_kernel,
        out_shape=jax.ShapeDtypeStruct((n, c, hw), x.dtype),
        grid_spec=pltpu.PrefetchScalarGridSpec(
            num_scalar_prefetch=0,
            grid=(c_blocks, n, hw_blocks),
            in_specs=[x_spec, p_spec, p_spec, p_spec],
            out_specs=x_spec),
        compiler_params=pltpu.CompilerParams(
            dimension_semantics=("parallel", "parallel", "parallel"),
            vmem_limit_bytes=usable),
    )(x3, scale, shift, a2)

    return out3.reshape(n, c, h, w)


# --------------------------------------------------------------------------
# Pure-JAX reference (PyTorch BatchNorm2d training mode + PReLU)
# --------------------------------------------------------------------------
def bn_prelu_ref(x, gamma, beta, alpha):
    xf = x.astype(jnp.float32)
    mean = jnp.mean(xf, axis=(0, 2, 3), keepdims=True)
    var = jnp.mean((xf - mean) ** 2, axis=(0, 2, 3), keepdims=True)
    y = (xf - mean) / jnp.sqrt(var + EPS)
    y = y * gamma.reshape(1, -1, 1, 1) + beta.reshape(1, -1, 1, 1)
    out = jnp.where(y > 0, y, alpha.reshape(1, -1, 1, 1) * y)
    return out.astype(x.dtype)


if __name__ == "__main__":
    key = jax.random.PRNGKey(0)
    kx, kg, kb, ka = jax.random.split(key, 4)

    N, C, H, W = 2, 4, 16, 16
    x = jax.random.normal(kx, (N, C, H, W), dtype=jnp.float32)

    gamma = 1.0 + 0.1 * jax.random.normal(kg, (C,), dtype=jnp.float32)
    beta = 0.1 * jax.random.normal(kb, (C,), dtype=jnp.float32)
    alpha = 0.25 + 0.05 * jax.random.normal(ka, (C,), dtype=jnp.float32)

    out = jax.block_until_ready(bn_prelu(x, gamma, beta, alpha))
    ref = jax.block_until_ready(bn_prelu_ref(x, gamma, beta, alpha))

    assert out.shape == x.shape and out.dtype == x.dtype
    assert jnp.allclose(out, ref, atol=1e-5, rtol=1e-5), "mismatch vs reference"
    print("KERNEL_OK")
</pallas_src>

<mosaic_0001>
module attributes {stable_mosaic.version = 11 : i64} {
  func.func @_fused_kernel(%arg0: i32, %arg1: memref<2x4x256xf32, #tpu.memory_space<vmem>>, %arg2: memref<4x1xf32, #tpu.memory_space<vmem>>, %arg3: memref<4x1xf32, #tpu.memory_space<vmem>>, %arg4: memref<4x1xf32, #tpu.memory_space<vmem>>, %arg5: memref<2x4x256xf32, #tpu.memory_space<vmem>>) attributes {dimension_semantics = [#tpu.dimension_semantics<parallel>], iteration_bounds = array<i64: 1>, scalar_prefetch = 0 : i64, scratch_operands = 0 : i64, tpu.core_type = #tpu.core_type<tc>, window_params = [{transform_indices = @transform_0, window_bounds = array<i64: 2, 4, 256>}, {transform_indices = @transform_1, window_bounds = array<i64: 4, 1>}, {transform_indices = @transform_2, window_bounds = array<i64: 4, 1>}, {transform_indices = @transform_3, window_bounds = array<i64: 4, 1>}, {transform_indices = @transform_4, window_bounds = array<i64: 2, 4, 256>}]} {
    %c0 = arith.constant 0 : index
    %c0_0 = arith.constant 0 : index
    %c0_1 = arith.constant 0 : index
    %0 = vector.load %arg1[%c0, %c0_0, %c0_1] : memref<2x4x256xf32, #tpu.memory_space<vmem>>, vector<2x4x256xf32>
    %cst = arith.constant dense<0.000000e+00> : vector<2x4xf32>
    %1 = vector.multi_reduction <add>, %0, %cst [2] : vector<2x4x256xf32> to vector<2x4xf32>
    %2 = vector.shape_cast %1 : vector<2x4xf32> to vector<2x4x1xf32>
    %cst_2 = arith.constant dense<0.000000e+00> : vector<4x1xf32>
    %3 = vector.multi_reduction <add>, %2, %cst_2 [0] : vector<2x4x1xf32> to vector<4x1xf32>
    %4 = vector.shape_cast %3 : vector<4x1xf32> to vector<1x4x1xf32>
    %5 = arith.mulf %0, %0 : vector<2x4x256xf32>
    %cst_3 = arith.constant dense<0.000000e+00> : vector<2x4xf32>
    %6 = vector.multi_reduction <add>, %5, %cst_3 [2] : vector<2x4x256xf32> to vector<2x4xf32>
    %7 = vector.shape_cast %6 : vector<2x4xf32> to vector<2x4x1xf32>
    %cst_4 = arith.constant dense<0.000000e+00> : vector<4x1xf32>
    %8 = vector.multi_reduction <add>, %7, %cst_4 [0] : vector<2x4x1xf32> to vector<4x1xf32>
    %9 = vector.shape_cast %8 : vector<4x1xf32> to vector<1x4x1xf32>
    %cst_5 = arith.constant 0.001953125 : f32
    %10 = vector.broadcast %cst_5 : f32 to vector<1x4x1xf32>
    %11 = arith.mulf %4, %10 : vector<1x4x1xf32>
    %cst_6 = arith.constant 0.001953125 : f32
    %12 = vector.broadcast %cst_6 : f32 to vector<1x4x1xf32>
    %13 = arith.mulf %9, %12 : vector<1x4x1xf32>
    %14 = arith.mulf %11, %11 : vector<1x4x1xf32>
    %15 = arith.subf %13, %14 : vector<1x4x1xf32>
    %cst_7 = arith.constant 0.000000e+00 : f32
    %16 = vector.broadcast %cst_7 : f32 to vector<1x4x1xf32>
    %17 = arith.maximumf %15, %16 : vector<1x4x1xf32>
    %cst_8 = arith.constant 1.000000e-03 : f32
    %18 = vector.broadcast %cst_8 : f32 to vector<1x4x1xf32>
    %19 = arith.addf %17, %18 : vector<1x4x1xf32>
    %20 = math.rsqrt %19 : vector<1x4x1xf32>
    %c0_9 = arith.constant 0 : index
    %c0_10 = arith.constant 0 : index
    %21 = vector.load %arg2[%c0_9, %c0_10] : memref<4x1xf32, #tpu.memory_space<vmem>>, vector<4x1xf32>
    %22 = vector.shape_cast %21 : vector<4x1xf32> to vector<1x4x1xf32>
    %c0_11 = arith.constant 0 : index
    %c0_12 = arith.constant 0 : index
    %23 = vector.load %arg3[%c0_11, %c0_12] : memref<4x1xf32, #tpu.memory_space<vmem>>, vector<4x1xf32>
    %24 = vector.shape_cast %23 : vector<4x1xf32> to vector<1x4x1xf32>
    %c0_13 = arith.constant 0 : index
    %c0_14 = arith.constant 0 : index
    %25 = vector.load %arg4[%c0_13, %c0_14] : memref<4x1xf32, #tpu.memory_space<vmem>>, vector<4x1xf32>
    %26 = vector.shape_cast %25 : vector<4x1xf32> to vector<1x4x1xf32>
    %27 = arith.mulf %22, %20 : vector<1x4x1xf32>
    %28 = arith.mulf %11, %27 : vector<1x4x1xf32>
    %29 = arith.subf %24, %28 : vector<1x4x1xf32>
    %30 = vector.broadcast %27 : vector<1x4x1xf32> to vector<2x4x256xf32>
    %31 = arith.mulf %0, %30 : vector<2x4x256xf32>
    %32 = vector.broadcast %29 : vector<1x4x1xf32> to vector<2x4x256xf32>
    %33 = arith.addf %31, %32 : vector<2x4x256xf32>
    %cst_15 = arith.constant 0.000000e+00 : f32
    %34 = vector.broadcast %cst_15 : f32 to vector<2x4x256xf32>
    %35 = arith.cmpf ogt, %33, %34 : vector<2x4x256xf32>
    %36 = vector.broadcast %26 : vector<1x4x1xf32> to vector<2x4x256xf32>
    %37 = arith.mulf %36, %33 : vector<2x4x256xf32>
    %38 = arith.select %35, %33, %37 : vector<2x4x256xi1>, vector<2x4x256xf32>
    %c0_16 = arith.constant 0 : index
    %c0_17 = arith.constant 0 : index
    %c0_18 = arith.constant 0 : index
    %39 = vector.load %arg5[%c0_16, %c0_17, %c0_18] : memref<2x4x256xf32, #tpu.memory_space<vmem>>, vector<2x4x256xf32>
    tpu.vector_store %arg5[%c0_16, %c0_17, %c0_18], %38 {strides = array<i32>} : memref<2x4x256xf32, #tpu.memory_space<vmem>>, vector<2x4x256xf32>,
    return
  }
  func.func @transform_0(%arg0: i32) -> (i32, i32, i32) {
    %c0_i32 = arith.constant 0 : i32
    %c0_i32_0 = arith.constant 0 : i32
    %c0_i32_1 = arith.constant 0 : i32
    return %c0_i32, %arg0, %c0_i32_0 : i32, i32, i32
  }
  func.func @transform_1(%arg0: i32) -> (i32, i32) {
    %c0_i32 = arith.constant 0 : i32
    %c0_i32_0 = arith.constant 0 : i32
    return %arg0, %c0_i32 : i32, i32
  }
  func.func @transform_2(%arg0: i32) -> (i32, i32) {
    %c0_i32 = arith.constant 0 : i32
    %c0_i32_0 = arith.constant 0 : i32
    return %arg0, %c0_i32 : i32, i32
  }
  func.func @transform_3(%arg0: i32) -> (i32, i32) {
    %c0_i32 = arith.constant 0 : i32
    %c0_i32_0 = arith.constant 0 : i32
    return %arg0, %c0_i32 : i32, i32
  }
  func.func @transform_4(%arg0: i32) -> (i32, i32, i32) {
    %c0_i32 = arith.constant 0 : i32
    %c0_i32_0 = arith.constant 0 : i32
    %c0_i32_1 = arith.constant 0 : i32
    return %c0_i32, %arg0, %c0_i32_0 : i32, i32, i32
  }
}

</mosaic_0001>

<bundles_post_ra>
// kernel: tpu_custom_call.1
= control target key start
LH: loop header
LB: loop body
LE: loop exit
PB: predicated region body
PF: predicated region fallthrough
CT: control target
= control target key end

     0   :  { %9 = vsyncpa [#allocation3], 0  ;;  %s320_s0 = inlined_call_operand.hbm [shape: f32[2,4,256], index: 0, kind: input, shape index: {}]   ;;  %s321_s1 = inlined_call_operand.vmem [shape: f32[4,1], index: 1, kind: input, shape index: {}]   ;;  %s322_s2 = inlined_call_operand.vmem [shape: f32[4,1], index: 2, kind: input, shape index: {}]   ;;  %s323_s3 = inlined_call_operand.vmem [shape: f32[4,1], index: 3, kind: input, shape index: {}]   ;;  %s324_s4 = inlined_call_operand.hbm [shape: f32[2,4,256], index: 4, kind: output, shape index: {}]  }
   0x1   :  { %10 = vsyncpa [#allocation4], 0  ;;  %s222_s15 = smov [#allocation2]   ;;  %s174_s19 = scalar_lea.hbm %s320_s0, 256 }
   0x2   :  { %s16_s16 = sshll.u32 %s222_s15, 4  ;;  %p175_p0 = scmp.ne.s32.totalorder %s320_s0, %s174_s19  ;;  %s17_s16 = int_to_ptr.vmem [resolvable:$true] %s16_s16 }
   0x3   :  { %p178_p1 = scmp.lt.u32.totalorder %s174_s19, %s320_s0 }
   0x5   :  { %p180_p2 = pnand %p178_p1, %p175_p0 }
   0x7   :  { %183 = shalt.err (!%p180_p2)
}
   0x8   :  { %s184_s24 = scalar_lea.vmem %s17_s16, 256  ;;  %p189_p4 = scmp.lt.s32.totalorder %s17_s16, %s17_s16 }
   0x9   :  { %p185_p3 = scmp.ne.s32.totalorder %s17_s16, %s184_s24  ;;  %p190_p5 = scmp.lt.s32.totalorder %s184_s24, %s184_s24 }
   0xb   :  { %p191_p6 = por %p190_p5, %p189_p4 }
   0xd   :  { %p192_p7 = pnand %p191_p6, %p185_p3 }
   0xf   :  { %195 = shalt.err (!%p192_p7)
}
  0x10   :  { %s223_s25 = smov 128   ;;  %s224_s26 = smov 8  }
  0x11   :  { %22 = dma.hbm_to_vmem [thread:$0]  %s320_s0, 256, %s17_s16, [#allocation3], %s223_s25, %s223_s25, %s224_s26  }
  0x12   :  { %218 = dma.done.wait [#allocation3], 256  }
  0x13   :  { %219 = vsyncadd [#allocation3], 4294967040  ;;  %vm40_vm0 = vcmask 1043456   ;;  %v268_v0 = vld [vmem:[#allocation2] sm:$0xff]  ;;  %v270_v1 = vld [vmem:[#allocation2 + $0x8] sm:$0xff]  ;;  %v225_v20 = vmov 0   ;;  %v95_v46 = vlaneseq }
  0x14   :  { %v36_v2 = vcombine.high %v268_v0, %v268_v0  ;;  %v41_v3 = vsel %vm40_vm0, %v268_v0, 0.0  ;;  %v54_v4 = vmul.f32 %v268_v0, %v268_v0  ;;  %v37_v5 = vcombine.high %v270_v1, %v270_v1  ;;  %168 = vset.pattern.permute.xlu0 %v225_v20  ;;  %169 = vset.pattern.permute.xlu1 %v225_v20  ;;  %v82_v37 = vld [vmem:[%s321_s1] sm:$0xf]  ;;  %s227_s1 = smov [#allocation5]  }
  0x15   :  { %v46_v6 = vsel %vm40_vm0, %v270_v1, 0.0  ;;  %v55_v7 = vmul.f32 %v270_v1, %v270_v1  ;;  %v83_v40 = vld [vmem:[%s322_s2] sm:$0xf]  ;;  %v226_v44 = vmov 839922192   ;;  %v96_v48 = vshrl.u32 %v95_v46, 7 }
  0x16   :  { %v42_v8 = vsel %vm40_vm0, %v36_v2, 0.0  ;;  %v58_v9 = vcombine.high %v54_v4, %v54_v4  ;;  %v62_v10 = vsel %vm40_vm0, %v54_v4, 0.0  ;;  %v47_v11 = vsel %vm40_vm0, %v37_v5, 0.0  ;;  %v84_v43 = vld [vmem:[%s323_s3] sm:$0xf]  ;;  %s150_s2 = sshll.u32 %s227_s1, 4  ;;  %s151_s2 = int_to_ptr.vmem [resolvable:$true] %s150_s2 }
  0x17   :  { %v43_v12 = vadd.f32 %v42_v8, %v41_v3  ;;  %v59_v13 = vcombine.high %v55_v7, %v55_v7  ;;  %v67_v15 = vsel %vm40_vm0, %v55_v7, 0.0  ;;  %v48_v17 = vadd.f32 %v47_v11, %v46_v6  ;;  %s196_s3 = scalar_lea.vmem %s151_s2, 256  ;;  %p201_p9 = scmp.lt.s32.totalorder %s151_s2, %s151_s2 }
  0x18   :  { %v63_v14 = vsel %vm40_vm0, %v58_v9, 0.0  ;;  %v93_v45 = vunpack.c.l.s4 %v226_v44  ;;  %p197_p8 = scmp.ne.s32.totalorder %s151_s2, %s196_s3  ;;  %p202_p10 = scmp.lt.s32.totalorder %s196_s3, %s196_s3 }
  0x19   :  { %44 = vadd.xlane.f32.xlu0 %v43_v12  ;;  %v64_v16 = vadd.f32 %v63_v14, %v62_v10  ;;  %v68_v18 = vsel %vm40_vm0, %v59_v13, 0.0 }
  0x1a   :  { %v69_v19 = vadd.f32 %v68_v18, %v67_v15  ;;  %v94_v47 = vunpack.c.0.s8 %v93_v45  ;;  %p203_p11 = por %p202_p10, %p201_p9 }
  0x1b   :  { %65 = vadd.xlane.f32.xlu1 %v64_v16 }
  0x1c   :  { %v97_v49 = vsub.s32 %v94_v47, %v96_v48  ;;  %p204_p12 = pnand %p203_p11, %p197_p8 }
  0x1d   :  { %49 = vadd.xlane.f32.xlu0 %v48_v17 }
  0x1f   :  { %70 = vadd.xlane.f32.xlu1 %v69_v19 }
  0xa6   :  { %v45_v21 = vpop.xlane.xlu0 %44 }
  0xa7   :  { %v51_v24 = vsel %vm40_vm0, %v45_v21, 0.0 }
  0xa8   :  { %v66_v22 = vpop.xlane.xlu1 %65 }
  0xa9   :  { %v72_v28 = vsel %vm40_vm0, %v66_v22, 0.0 }
  0xaa   :  { %v50_v23 = vpop.xlane.xlu0 %49 }
  0xab   :  { %v52_v25 = vsel %vm40_vm0, %v50_v23, 0.0 }
  0xac   :  { %v53_v26 = vadd.f32 %v52_v25, %v51_v24  ;;  %v71_v27 = vpop.xlane.xlu1 %70 }
  0xad   :  { %v73_v29 = vsel %vm40_vm0, %v71_v27, 0.0 }
  0xae   :  { %v75_v30 = vmul.f32 0.001953125, %v53_v26  ;;  %v74_v31 = vadd.f32 %v73_v29, %v72_v28 }
  0xb0   :  { %v77_v32 = vmul.f32 %v75_v30, %v75_v30  ;;  %v76_v33 = vmul.f32 0.001953125, %v74_v31 }
  0xb2   :  { %v78_v34 = vsub.f32 %v76_v33, %v77_v32 }
  0xb4   :  { %v79_v35 = vmax.f32 %v78_v34, 0.0 }
  0xb6   :  { %v80_v36 = vadd.f32 0.001, %v79_v35 }
  0xb8   :  { %172 = vrsqrt.f32 %v80_v36 }
  0xc2   :  { %v173_v38 = vpop.eup %172 }
  0xc3   :  { %v85_v39 = vmul.f32 %v173_v38, %v82_v37 }
  0xc5   :  { %90 = vperm.xlu0 %168, %v85_v39   ;;  %v86_v41 = vmul.f32 %v85_v39, %v75_v30 }
  0xc7   :  { %v87_v42 = vsub.f32 %v83_v40, %v86_v41 }
  0xc9   :  { %104 = vperm.xlu1 %169, %v87_v42  }
  0xcd   :  { %120 = vperm.xlu1 %169, %v84_v43  }
 0x144   :  { %v91_v50 = vpop.permute.xlu0 %90 }
 0x145   :  { %v98_v51 = vrot.slane %v91_v50, %v97_v49 }
 0x147   :  { %v100_v53 = vmul.f32 %v98_v51, %v268_v0  ;;  %v101_v54 = vmul.f32 %v98_v51, %v270_v1 }
 0x148   :  { %v105_v52 = vpop.permute.xlu1 %104 }
 0x149   :  { %v112_v55 = vrot.slane %v105_v52, %v97_v49 }
 0x14b   :  { %v114_v56 = vadd.f32 %v112_v55, %v100_v53  ;;  %v115_v57 = vadd.f32 %v112_v55, %v101_v54 }
 0x14c   :  { %v121_v58 = vpop.permute.xlu1 %120 }
 0x14d   :  { %v125_v59 = vcombine.high %v114_v56, %v114_v56  ;;  %v126_v60 = vcombine.high %v115_v57, %v115_v57  ;;  %v129_v61 = vmul.f32 %v121_v58, %v114_v56  ;;  %v131_v63 = vmul.f32 %v121_v58, %v115_v57 }
 0x14e   :  { %vm116_vm1 = vcmp.gt.f32.partialorder %v114_v56, 0.0  ;;  %vm117_vm2 = vcmp.gt.f32.partialorder %v115_v57, 0.0 }
 0x14f   :  { %v130_v62 = vmul.f32 %v125_v59, %v121_v58  ;;  %v132_v2 = vmul.f32 %v126_v60, %v121_v58 }
 0x151   :  { %v137_v3 = vcombine.low %v129_v61, %v130_v62  ;;  %v138_v4 = vcombine.low %v131_v63, %v132_v2 }
 0x153   :  { %v141_v0 = vsel %vm116_vm1, %v114_v56, %v137_v3  ;;  %v142_v5 = vsel %vm117_vm2, %v115_v57, %v138_v4 }
 0x154   :  { %143 = vst [vmem:[#allocation5] sm:$0xff] %v141_v0  ;;  %144 = vst [vmem:[#allocation5 + $0x8] sm:$0xff] %v142_v5 }
 0x155   :  { %207 = shalt.err (!%p204_p12)
}
 0x156   :  { %s208_s10 = scalar_lea.hbm %s324_s4, 256 }
 0x157   :  { %p209_p13 = scmp.ne.s32.totalorder %s324_s4, %s208_s10  ;;  %p212_p0 = scmp.lt.u32.totalorder %s208_s10, %s324_s4 }
 0x159   :  { %p214_p1 = pnand %p212_p0, %p209_p13 }
 0x15b   :  { %217 = shalt.err (!%p214_p1)
}
 0x15c   :  { %156 = dma.vmem_to_hbm [thread:$0]  %s151_s2, 256, %s324_s4, [#allocation4], %s223_s25, %s223_s25, %s224_s26  }
 0x15d   :  { %220 = dma.done.wait [#allocation4], 256  }
 0x15e   :  { %221 = vsyncadd [#allocation4], 4294967040 }
 0x15f   :  { %160 = vsyncpa [#allocation3], 1 }
 0x160   :  { %161 = vsyncpa [#allocation4], 1 }

</bundles_post_ra>
